<compile_context>
chip_gen: v5e
topology: v5e:2x2
jax: 0.10.0
libtpu: 0.0.40
codegen_flags: <defaults>
</compile_context>

<pallas_src>
import jax
import jax.numpy as jnp
from jax.experimental import pallas as pl
from jax.experimental.pallas import tpu as pltpu

_LANE = 128
_SUBLANE = 8
_HP = jax.lax.Precision.HIGHEST


def _round_up(n, m):
    return ((n + m - 1) // m) * m


def _pad_lanes(v, lanes):
    """Pad the last axis of a (rows, cols) array with zeros up to `lanes`."""
    pad = lanes - v.shape[1]
    if pad == 0:
        return v
    return jnp.concatenate([v, jnp.zeros((v.shape[0], pad), v.dtype)], axis=1)


# ---------------------------------------------------------------------------
# One-time parameter preparation (hoisted out of the per-call path).
# ---------------------------------------------------------------------------
def prepare_params(params):
    """Torch-layout params in, kernel-layout packed slab out.

    Kernel layouts:
      w1  : (attr_dim, hid_dim)   == fc1.weight.T
      b1  : (1, hid_dim)
      w23 : (hid_dim, proto_dim)  == fc2.weight.T @ fc3.weight.T  (fc2 has no act)
      b23 : (1, proto_dim)        == fc2.bias @ fc3.weight.T + fc3.bias

    All four are packed into one (rows, 128) f32 slab so the kernel needs a
    single parameter DMA.  Row offsets are sublane(8)-aligned.
    """
    w1 = params["w1"].T.astype(jnp.float32)
    b1 = params["b1"].reshape(1, -1).astype(jnp.float32)
    w3t = params["w3"].T.astype(jnp.float32)
    w23 = jnp.dot(params["w2"].T.astype(jnp.float32), w3t, precision=_HP)
    b23 = (jnp.dot(params["b2"].reshape(1, -1).astype(jnp.float32), w3t, precision=_HP)
           + params["b3"].reshape(1, -1).astype(jnp.float32))

    attr_dim, hid_dim = w1.shape
    proto_dim = w23.shape[1]

    b1_row = _round_up(attr_dim, _SUBLANE)
    w23_row = b1_row + _SUBLANE
    b23_row = w23_row + _round_up(hid_dim, _SUBLANE)
    n_rows = _round_up(b23_row + 1, _SUBLANE)
    n_lanes = _round_up(max(hid_dim, proto_dim), _LANE)

    slab = jnp.zeros((n_rows, n_lanes), jnp.float32)
    slab = slab.at[0:attr_dim, 0:hid_dim].set(w1)
    slab = slab.at[b1_row:b1_row + 1, 0:hid_dim].set(b1)
    slab = slab.at[w23_row:w23_row + hid_dim, 0:proto_dim].set(w23)
    slab = slab.at[b23_row:b23_row + 1, 0:proto_dim].set(b23)

    meta = dict(attr_dim=attr_dim, hid_dim=hid_dim, proto_dim=proto_dim,
                b1_row=b1_row, w23_row=w23_row, b23_row=b23_row)
    # Keep the unpacked matrices too (used by the attrs-static fast path).
    return {"slab": slab, "w1": w1, "b1": b1, "w23": w23, "b23": b23, "meta": meta}


# ---------------------------------------------------------------------------
# Full-semantics forward: x, attrs -> logits (single fused Pallas kernel).
# ---------------------------------------------------------------------------
def normalized_classifier_forward(x, attrs, kparams):
    """x: (B, proto_dim), attrs: (C, attr_dim) -> logits (B, C)."""
    B = x.shape[0]
    C = attrs.shape[0]
    meta = kparams["meta"]
    attr_dim = meta["attr_dim"]
    hid_dim = meta["hid_dim"]
    proto_dim = meta["proto_dim"]
    b1_row, w23_row, b23_row = meta["b1_row"], meta["w23_row"], meta["b23_row"]
    c_pad = _round_up(max(C, _LANE), _LANE)   # lane-dense output store

    def kernel(x_ref, attrs_ref, slab_ref, out_ref):
        # Static sub-views of the packed parameter slab (zero-cost slicing).
        w1 = slab_ref[0:attr_dim, 0:hid_dim]                       # (attr, hid)
        b1 = slab_ref[b1_row:b1_row + 1, 0:hid_dim]                # (1, hid)
        w23 = slab_ref[w23_row:w23_row + hid_dim, 0:proto_dim]     # (hid, proto)
        b23 = slab_ref[b23_row:b23_row + 1, 0:proto_dim]           # (1, proto)

        attrs_v = attrs_ref[...]                                   # (C, attr)
        h1 = jnp.maximum(
            jnp.dot(attrs_v, w1, preferred_element_type=jnp.float32,
                    precision=_HP) + b1, 0.0)                      # relu(fc1)
        protos = jnp.maximum(
            jnp.dot(h1, w23, preferred_element_type=jnp.float32,
                    precision=_HP) + b23, 0.0)                     # relu(fc3); fc2 folded

        xv = x_ref[...]                                            # (B, proto)
        # Row-wise inverse L2 norms via rsqrt (EUP).  NOTE: mirrors the torch
        # module exactly -- no eps, so an all-zero row yields inf/nan just
        # like the reference.
        inv_xn = jax.lax.rsqrt(jnp.sum(xv * xv, axis=1, keepdims=True))          # (B, 1)
        inv_pn = jax.lax.rsqrt(jnp.sum(protos * protos, axis=1, keepdims=True))  # (C, 1)

        p_ns = protos * inv_pn                                     # (C, proto)
        raw = jax.lax.dot_general(
            xv, p_ns,
            dimension_numbers=(((1,), (1,)), ((), ())),            # x @ p_ns^T
            preferred_element_type=jnp.float32, precision=_HP)     # (B, C)
        scaled = raw * (25.0 * inv_xn)                             # fold both 5x scales
        out_ref[...] = _pad_lanes(scaled, c_pad)                   # full-width unmasked store

    vmem = pl.BlockSpec(memory_space=pltpu.MemorySpace.VMEM)
    out = pl.pallas_call(
        kernel,
        out_shape=jax.ShapeDtypeStruct((B, c_pad), jnp.float32),
        in_specs=[vmem, vmem, vmem],
        out_specs=vmem,
    )(x, attrs, kparams["slab"])
    return out[:, :C]


# ---------------------------------------------------------------------------
# Fast path when `attrs` is static across calls (typical: class attributes).
# The entire prototype branch is hoisted out of the per-call kernel.
# ---------------------------------------------------------------------------
def precompute_prototypes(attrs, kparams):
    """One-time: unit-normalized prototype rows p_ns (C, proto_dim)."""
    h1 = jnp.maximum(jnp.dot(attrs, kparams["w1"], precision=_HP) + kparams["b1"], 0.0)
    protos = jnp.maximum(jnp.dot(h1, kparams["w23"], precision=_HP) + kparams["b23"], 0.0)
    inv_pn = jax.lax.rsqrt(jnp.sum(protos * protos, axis=1, keepdims=True))
    return protos * inv_pn


def normalized_classifier_apply(x, p_ns):
    """Per-call kernel for the cached path: one matmul, two input DMAs."""
    B = x.shape[0]
    C = p_ns.shape[0]
    c_pad = _round_up(max(C, _LANE), _LANE)

    def kernel(x_ref, pns_ref, out_ref):
        xv = x_ref[...]
        inv_xn = jax.lax.rsqrt(jnp.sum(xv * xv, axis=1, keepdims=True))
        raw = jax.lax.dot_general(
            xv, pns_ref[...],
            dimension_numbers=(((1,), (1,)), ((), ())),
            preferred_element_type=jnp.float32, precision=_HP)
        out_ref[...] = _pad_lanes(raw * (25.0 * inv_xn), c_pad)

    vmem = pl.BlockSpec(memory_space=pltpu.MemorySpace.VMEM)
    out = pl.pallas_call(
        kernel,
        out_shape=jax.ShapeDtypeStruct((B, c_pad), jnp.float32),
        in_specs=[vmem, vmem],
        out_specs=vmem,
    )(x, p_ns)
    return out[:, :C]


# ---------------------------------------------------------------------------
# Init + pure-JAX reference (unfused, mirrors the PyTorch forward).
# ---------------------------------------------------------------------------
def init_params(key, attr_dim, hid_dim, proto_dim):
    k1, k2, k3, k4, k5, k6 = jax.random.split(key, 6)

    def lin_init(kw, kb, fan_in, shape_w, shape_b):
        bound = 1.0 / jnp.sqrt(fan_in)          # PyTorch nn.Linear default
        w = jax.random.uniform(kw, shape_w, jnp.float32, -bound, bound)
        b = jax.random.uniform(kb, shape_b, jnp.float32, -bound, bound)
        return w, b

    w1, b1 = lin_init(k1, k2, attr_dim, (hid_dim, attr_dim), (hid_dim,))
    w2, b2 = lin_init(k3, k4, hid_dim, (hid_dim, hid_dim), (hid_dim,))
    # fc3: custom weight init uniform(-b, b), b = sqrt(3 / (hid_dim * proto_dim))
    wb = jnp.sqrt(3.0 / (hid_dim * proto_dim))
    w3 = jax.random.uniform(k5, (proto_dim, hid_dim), jnp.float32, -wb, wb)
    b3 = jax.random.uniform(k6, (proto_dim,), jnp.float32,
                            -1.0 / jnp.sqrt(hid_dim), 1.0 / jnp.sqrt(hid_dim))
    return {"w1": w1, "b1": b1, "w2": w2, "b2": b2, "w3": w3, "b3": b3}


def reference_forward(x, attrs, params):
    h = jnp.maximum(jnp.dot(attrs, params["w1"].T, precision=_HP) + params["b1"], 0.0)
    h = jnp.dot(h, params["w2"].T, precision=_HP) + params["b2"]
    protos = jnp.maximum(jnp.dot(h, params["w3"].T, precision=_HP) + params["b3"], 0.0)
    x_ns = 5.0 * x / jnp.linalg.norm(x, axis=1, keepdims=True)
    p_ns = 5.0 * protos / jnp.linalg.norm(protos, axis=1, keepdims=True)
    return jnp.dot(x_ns, p_ns.T, precision=_HP)


if __name__ == "__main__":
    # Small shapes consistent with the module's forward:
    #   attr_dim=16, hid_dim=32, proto_dim=64, batch B=8, num_classes C=8
    attr_dim, hid_dim, proto_dim = 16, 32, 64
    B, C = 8, 8

    key = jax.random.PRNGKey(0)
    kx, ka, kp = jax.random.split(key, 3)

    x = jax.random.normal(kx, (B, proto_dim), dtype=jnp.float32)
    attrs = jax.random.normal(ka, (C, attr_dim), dtype=jnp.float32)
    params = init_params(kp, attr_dim, hid_dim, proto_dim)

    # One-time layout / fc2-fc3 fusion / slab packing (off the per-call path).
    kparams = prepare_params(params)
    jax.block_until_ready(kparams["slab"])

    ref = reference_forward(x, attrs, params)

    # Full-semantics path (attrs provided per call).
    logits = jax.block_until_ready(normalized_classifier_forward(x, attrs, kparams))
    assert logits.shape == (B, C)
    assert bool(jnp.all(jnp.isfinite(logits)))
    assert jnp.allclose(logits, ref, atol=2e-4, rtol=2e-4), "full-path mismatch vs reference"

    # Cached path (attrs static across calls): prototype branch hoisted offline.
    p_ns = jax.block_until_ready(precompute_prototypes(attrs, kparams))
    logits_cached = jax.block_until_ready(normalized_classifier_apply(x, p_ns))
    assert logits_cached.shape == (B, C)
    assert jnp.allclose(logits_cached, ref, atol=2e-4, rtol=2e-4), "cached-path mismatch vs reference"

    print("KERNEL_OK")
</pallas_src>

<mosaic_0001>
module attributes {stable_mosaic.version = 11 : i64} {
  func.func @kernel(%arg0: memref<8x64xf32, #tpu.memory_space<vmem>>, %arg1: memref<8x16xf32, #tpu.memory_space<vmem>>, %arg2: memref<64x128xf32, #tpu.memory_space<vmem>>, %arg3: memref<8x128xf32, #tpu.memory_space<vmem>>) attributes {dimension_semantics = [], scalar_prefetch = 0 : i64, scratch_operands = 0 : i64, tpu.core_type = #tpu.core_type<tc>} {
    %c0 = arith.constant 0 : index
    %c0_0 = arith.constant 0 : index
    %0 = vector.load %arg2[%c0, %c0_0] : memref<64x128xf32, #tpu.memory_space<vmem>>, vector<16x32xf32>
    %c16 = arith.constant 16 : index
    %c0_1 = arith.constant 0 : index
    %1 = vector.load %arg2[%c16, %c0_1] : memref<64x128xf32, #tpu.memory_space<vmem>>, vector<1x32xf32>
    %c24 = arith.constant 24 : index
    %c0_2 = arith.constant 0 : index
    %2 = vector.load %arg2[%c24, %c0_2] : memref<64x128xf32, #tpu.memory_space<vmem>>, vector<32x64xf32>
    %c56 = arith.constant 56 : index
    %c0_3 = arith.constant 0 : index
    %3 = vector.load %arg2[%c56, %c0_3] : memref<64x128xf32, #tpu.memory_space<vmem>>, vector<1x64xf32>
    %c0_4 = arith.constant 0 : index
    %c0_5 = arith.constant 0 : index
    %4 = vector.load %arg1[%c0_4, %c0_5] : memref<8x16xf32, #tpu.memory_space<vmem>>, vector<8x16xf32>
    %cst = arith.constant dense<0.000000e+00> : vector<8x32xf32>
    %5 = tpu.matmul %4, %0, %cst {dimension_numbers = #tpu.dot_dimension_numbers<[1], [0], [0], [1], [0, 0, 1, 1], [], []>, precision = #tpu.contract_precision<fp32>} : vector<8x16xf32>, vector<16x32xf32>, vector<8x32xf32> -> vector<8x32xf32>
    %6 = vector.broadcast %1 : vector<1x32xf32> to vector<8x32xf32>
    %7 = arith.addf %5, %6 : vector<8x32xf32>
    %cst_6 = arith.constant 0.000000e+00 : f32
    %8 = vector.broadcast %cst_6 : f32 to vector<8x32xf32>
    %9 = arith.maximumf %7, %8 : vector<8x32xf32>
    %cst_7 = arith.constant dense<0.000000e+00> : vector<8x64xf32>
    %10 = tpu.matmul %9, %2, %cst_7 {dimension_numbers = #tpu.dot_dimension_numbers<[1], [0], [0], [1], [0, 0, 1, 1], [], []>, precision = #tpu.contract_precision<fp32>} : vector<8x32xf32>, vector<32x64xf32>, vector<8x64xf32> -> vector<8x64xf32>
    %11 = vector.broadcast %3 : vector<1x64xf32> to vector<8x64xf32>
    %12 = arith.addf %10, %11 : vector<8x64xf32>
    %cst_8 = arith.constant 0.000000e+00 : f32
    %13 = vector.broadcast %cst_8 : f32 to vector<8x64xf32>
    %14 = arith.maximumf %12, %13 : vector<8x64xf32>
    %c0_9 = arith.constant 0 : index
    %c0_10 = arith.constant 0 : index
    %15 = vector.load %arg0[%c0_9, %c0_10] : memref<8x64xf32, #tpu.memory_space<vmem>>, vector<8x64xf32>
    %16 = arith.mulf %15, %15 : vector<8x64xf32>
    %cst_11 = arith.constant dense<0.000000e+00> : vector<8xf32>
    %17 = vector.multi_reduction <add>, %16, %cst_11 [1] : vector<8x64xf32> to vector<8xf32>
    %18 = vector.shape_cast %17 : vector<8xf32> to vector<8x1xf32>
    %19 = math.rsqrt %18 : vector<8x1xf32>
    %20 = arith.mulf %14, %14 : vector<8x64xf32>
    %cst_12 = arith.constant dense<0.000000e+00> : vector<8xf32>
    %21 = vector.multi_reduction <add>, %20, %cst_12 [1] : vector<8x64xf32> to vector<8xf32>
    %22 = vector.shape_cast %21 : vector<8xf32> to vector<8x1xf32>
    %23 = math.rsqrt %22 : vector<8x1xf32>
    %24 = vector.broadcast %23 : vector<8x1xf32> to vector<8x64xf32>
    %25 = arith.mulf %14, %24 : vector<8x64xf32>
    %cst_13 = arith.constant dense<0.000000e+00> : vector<8x8xf32>
    %26 = tpu.matmul %15, %25, %cst_13 {dimension_numbers = #tpu.dot_dimension_numbers<[1], [1], [0], [0], [0, 0, 1, 0], [], []>, precision = #tpu.contract_precision<fp32>} : vector<8x64xf32>, vector<8x64xf32>, vector<8x8xf32> -> vector<8x8xf32>
    %cst_14 = arith.constant 2.500000e+01 : f32
    %27 = vector.broadcast %cst_14 : f32 to vector<8x1xf32>
    %28 = arith.mulf %27, %19 : vector<8x1xf32>
    %29 = vector.broadcast %28 : vector<8x1xf32> to vector<8x8xf32>
    %30 = arith.mulf %26, %29 : vector<8x8xf32>
    %cst_15 = arith.constant 0.000000e+00 : f32
    %31 = vector.broadcast %cst_15 : f32 to vector<8x120xf32>
    %32 = tpu.concatenate %30, %31 in 1 : vector<8x8xf32>, vector<8x120xf32> -> vector<8x128xf32>
    %c0_16 = arith.constant 0 : index
    %c0_17 = arith.constant 0 : index
    %33 = vector.load %arg3[%c0_16, %c0_17] : memref<8x128xf32, #tpu.memory_space<vmem>>, vector<8x128xf32>
    tpu.vector_store %arg3[%c0_16, %c0_17], %32 {strides = array<i32>} : memref<8x128xf32, #tpu.memory_space<vmem>>, vector<8x128xf32>,
    return
  }
}

</mosaic_0001>

<bundles_post_ra>
// kernel: tpu_custom_call.1
= control target key start
LH: loop header
LB: loop body
LE: loop exit
PB: predicated region body
PF: predicated region fallthrough
CT: control target
= control target key end

     0   :  { %8 = vsyncpa [#allocation3], 0  ;;  %s785_s0 = inlined_call_operand.hbm [shape: f32[8,64], index: 0, kind: input, shape index: {}]   ;;  %s786_s1 = inlined_call_operand.hbm [shape: f32[8,16], index: 1, kind: input, shape index: {}]   ;;  %s787_s2 = inlined_call_operand.hbm [shape: f32[64,128], index: 2, kind: input, shape index: {}]   ;;  %s788_s3 = inlined_call_operand.hbm [shape: f32[8,128], index: 3, kind: output, shape index: {}]  }
   0x1   :  { %9 = vsyncpa [#allocation6], 0  ;;  %s27_s14 = sshll.u32 %s786_s1, 4  ;;  %s28_s14 = int_to_ptr.hbm [resolvable:$true] %s27_s14 }
   0x2   :  { %10 = vsyncpa [#allocation4], 0  ;;  %s743_s15 = smov [#allocation5]   ;;  %s16_s19 = sshll.u32 %s785_s0, 4  ;;  %s17_s19 = int_to_ptr.hbm [resolvable:$true] %s16_s19 }
   0x3   :  { %s29_s16 = sshll.u32 %s743_s15, 4  ;;  %s744_s20 = smov [#allocation2]   ;;  %s30_s16 = int_to_ptr.vmem [resolvable:$true] %s29_s16 }
   0x4   :  { %32 = dma.hbm_to_vmem [thread:$0]  %s28_s14, 128, %s30_s16, [#allocation6]  }
   0x5   :  { %s18_s21 = sshll.u32 %s744_s20, 4  ;;  %s37_s24 = sshll.u32 %s787_s2, 4  ;;  %s19_s21 = int_to_ptr.vmem [resolvable:$true] %s18_s21  ;;  %s38_s24 = int_to_ptr.hbm [resolvable:$true] %s37_s24 }
   0x6   :  { %21 = dma.hbm_to_vmem [thread:$0]  %s17_s19, 128, %s19_s21, [#allocation3]  }
   0x7   :  { %s745_s1 = smov [#allocation7]   ;;  %s746_s26 = smov 128  }
   0x8   :  { %s39_s25 = sshll.u32 %s745_s1, 4  ;;  %s747_s27 = smov 8   ;;  %s40_s25 = int_to_ptr.vmem [resolvable:$true] %s39_s25 }
   0x9   :  { %45 = dma.hbm_to_vmem [thread:$0]  %s38_s24, 1024, %s40_s25, [#allocation6], %s746_s26, %s746_s26, %s747_s27  }
   0xa   :  { %737 = dma.done.wait [#allocation3], 128  }
   0xb   :  { %738 = vsyncadd [#allocation3], 4294967168 }
   0xc   :  { %739 = dma.done.wait [#allocation6], 1152  }
   0xd   :  { %740 = vsyncadd [#allocation6], 4294966144  ;;  %vm68_vm0 = vcmask 130048   ;;  %v59_v0 = vld [vmem:[#allocation7 + $0x8] sm:$0xff]  ;;  %v58_v1 = vld [vmem:[#allocation7] sm:$0xff]  ;;  %vm233_vm1 = vcmask 261120  }
   0xe   :  { %v66_v2 = vld [vmem:[#allocation5] sm:$0xff]  ;;  %v86_v3 = vand.u32 4294901760, %v59_v0  ;;  %v88_v4 = vand.u32 4294901760, %v58_v1  ;;  %v64_v19 = vld [vmem:[#allocation7 + $0x30] sm:$0xff]  ;;  %v63_v21 = vld [vmem:[#allocation7 + $0x28] sm:$0xff]  ;;  %vm425_vm2 = vcmask 523264  }
   0xf   :  { %v70_v5 = vsel %vm68_vm0, %v66_v2, 0  ;;  %v249_v20 = vand.u32 4294901760, %v64_v19  ;;  %v251_v23 = vand.u32 4294901760, %v63_v21  ;;  %v62_v24 = vld [vmem:[#allocation7 + $0x20] sm:$0xff]  ;;  %v61_v28 = vld [vmem:[#allocation7 + $0x18] sm:$0xff]  ;;  %s748_s0 = smov [#allocation8]  }
  0x10   :  { %v90_v6 = vand.u32 4294901760, %v70_v5  ;;  %v114_v7 = vsub.f32 %v59_v0, %v86_v3  ;;  %87 = vmatpush.msra.mxu0 %v86_v3  ;;  %v120_v8 = vsub.f32 %v58_v1, %v88_v4  ;;  %171 = vmatpush.msra.mxu3 %v86_v3  ;;  %v253_v27 = vand.u32 4294901760, %v62_v24  ;;  %v635_v43 = vld [vmem:[#allocation7 + $0x10] ss:$0 sm:$0xff]  ;;  %v636_v63 = vld [vmem:[#allocation7 + $0x38] ss:$0 sm:$0xff] }
  0x11   :  { %v279_v22 = vsub.f32 %v64_v19, %v249_v20  ;;  %v285_v26 = vsub.f32 %v63_v21, %v251_v23  ;;  %v255_v32 = vand.u32 4294901760, %v61_v28  ;;  %s616_s2 = sshll.u32 %s748_s0, 4  ;;  %s618_s30 = sshll.u32 %s788_s3, 4  ;;  %vm608_vm9 = vcmask 64512   ;;  %s617_s2 = int_to_ptr.vmem [resolvable:$true] %s616_s2  ;;  %s619_s30 = int_to_ptr.hbm [resolvable:$true] %s618_s30 }
  0x12   :  { %v91_v9 = vsub.f32 %v70_v5, %v90_v6  ;;  %146 = vmatpush.msra.mxu2 %v114_v7  ;;  %89 = vmatpush.msra.mxu0 %v88_v4  ;;  %v115_v10 = vand.u32 4294901760, %v114_v7  ;;  %v121_v11 = vand.u32 4294901760, %v120_v8  ;;  %v291_v31 = vsub.f32 %v62_v24, %v253_v27 }
  0x13   :  { %173 = vmatpush.msra.mxu3 %v88_v4  ;;  %v280_v25 = vand.u32 4294901760, %v279_v22  ;;  %v286_v30 = vand.u32 4294901760, %v285_v26  ;;  %v297_v36 = vsub.f32 %v61_v28, %v255_v32 }
  0x14   :  { %v92_v12 = vand.u32 4294901760, %v91_v9  ;;  %149 = vmatpush.msra.mxu2 %v120_v8  ;;  %v116_v13 = vsub.f32 %v114_v7, %v115_v10  ;;  %v122_v14 = vsub.f32 %v120_v8, %v121_v11  ;;  %198 = vmatpush.msrb.mxu0 %v115_v10  ;;  %v292_v35 = vand.u32 4294901760, %v291_v31 }
  0x15   :  { %152 = vmatmul.f32.vlgmr.msra.gmra.mxu2 %v91_v9  ;;  %v281_v29 = vsub.f32 %v279_v22, %v280_v25  ;;  %v287_v34 = vsub.f32 %v285_v26, %v286_v30  ;;  %v298_v39 = vand.u32 4294901760, %v297_v36 }
  0x16   :  { %v93_v15 = vsub.f32 %v91_v9, %v92_v12  ;;  %177 = vmatmul.f32.vlgmr.msra.gmra.mxu3 %v92_v12  ;;  %v117_v16 = vand.u32 4294901760, %v116_v13  ;;  %v123_v17 = vand.u32 4294901760, %v122_v14  ;;  %202 = vmatpush.msrb.mxu0 %v121_v11  ;;  %v293_v38 = vsub.f32 %v291_v31, %v292_v35 }
  0x17   :  { %250 = vmatpush.msrb.mxu2 %v249_v20  ;;  %v282_v33 = vand.u32 4294901760, %v281_v29  ;;  %v288_v37 = vand.u32 4294901760, %v287_v34  ;;  %v299_v41 = vsub.f32 %v297_v36, %v298_v39 }
  0x18   :  { %v94_v18 = vand.u32 4294901760, %v93_v15  ;;  %118 = vmatpush.msra.mxu1 %v117_v16  ;;  %v294_v40 = vand.u32 4294901760, %v293_v38  ;;  %v423_v15 = vld [vmem:[#allocation2] sm:$0xff] }
  0x19   :  { %252 = vmatpush.msrb.mxu2 %v251_v23  ;;  %283 = vmatpush.msrb.mxu3 %v282_v33  ;;  %v300_v42 = vand.u32 4294901760, %v299_v41  ;;  %v424_v16 = vmul.f32 %v423_v15, %v423_v15  ;;  %v455_v19 = vsel %vm425_vm2, %v423_v15, 0 }
  0x1a   :  { %95 = vmatmul.f32.vlgmr.msra.gmra.mxu0 %v94_v18  ;;  %124 = vmatpush.msra.mxu1 %v123_v17  ;;  %v477_v21 = vand.u32 4294901760, %v455_v19 }
  0x1b   :  { %126 = vmatmul.f32.vlgmr.msra.gmra.mxu1 %v90_v6  ;;  %321 = vmatpush.msra.mxu0 %v279_v22  ;;  %v426_v17 = vsel %vm425_vm2, %v424_v16, 0.0 }
  0x1c   :  { %223 = vmatpush.msrb.mxu1 %v86_v3  ;;  %254 = vmatpush.msrb.mxu2 %v253_v27  ;;  %v478_v24 = vsub.f32 %v455_v19, %v477_v21 }
  0x1d   :  { %324 = vmatpush.msra.mxu0 %v285_v26  ;;  %289 = vmatpush.msrb.mxu3 %v288_v37 }
  0x1e   :  { %225 = vmatpush.msrb.mxu1 %v88_v4  ;;  %256 = vmatpush.msrb.mxu2 %v255_v32 }
  0x1f   :  { %327 = vmatpush.msra.mxu0 %v291_v31  ;;  %295 = vmatpush.msrb.mxu3 %v294_v40 }
  0x20   :  { %350 = vmatpush.msra.mxu1 %v249_v20  ;;  %379 = vmatpush.msra.mxu2 %v280_v25 }
  0x21   :  { %330 = vmatpush.msra.mxu0 %v297_v36  ;;  %301 = vmatpush.msrb.mxu3 %v300_v42 }
  0x22   :  { %204 = vmatmul.f32.vlgmr.msrb.gmra.mxu0 %v90_v6  ;;  %352 = vmatpush.msra.mxu1 %v251_v23 }
  0x23   :  { %227 = vmatmul.f32.vlgmr.msrb.gmra.mxu1 %v90_v6  ;;  %383 = vmatpush.msra.mxu2 %v286_v30 }
  0x24   :  { %354 = vmatpush.msra.mxu1 %v253_v27  ;;  %410 = vmatpush.msra.mxu3 %v249_v20 }
  0x25   :  { %387 = vmatpush.msra.mxu2 %v292_v35 }
  0x26   :  { %356 = vmatpush.msra.mxu1 %v255_v32  ;;  %412 = vmatpush.msra.mxu3 %v251_v23 }
  0x27   :  { %391 = vmatpush.msra.mxu2 %v298_v39 }
  0x28   :  { %414 = vmatpush.msra.mxu3 %v253_v27  ;;  %v479_v27 = vand.u32 4294901760, %v478_v24 }
  0x2a   :  { %416 = vmatpush.msra.mxu3 %v255_v32  ;;  %v480_v31 = vsub.f32 %v478_v24, %v479_v27 }
  0x2c   :  { %v481_v34 = vand.u32 4294901760, %v480_v31 }
  0x97   :  { %v96_v44 = vpop.f32.mrf.mxu0 }
  0x98   :  { %v97_v45 = vadd.f32 %v635_v43, %v96_v44  ;;  %v127_v46 = vpop.f32.mrf.mxu1  ;;  %v153_v47 = vpop.f32.mrf.mxu2 }
  0x99   :  { %v178_v49 = vpop.f32.mrf.mxu3 }
  0x9a   :  { %v128_v48 = vadd.f32 %v127_v46, %v97_v45 }
  0x9c   :  { %v154_v50 = vadd.f32 %v153_v47, %v128_v48 }
  0x9e   :  { %v179_v51 = vadd.f32 %v178_v49, %v154_v50 }
  0x9f   :  { %v205_v52 = vpop.f32.mrf.mxu0 }
  0xa0   :  { %v206_v53 = vadd.f32 %v205_v52, %v179_v51  ;;  %v228_v54 = vpop.f32.mrf.mxu1 }
  0xa2   :  { %v229_v55 = vadd.f32 %v228_v54, %v206_v53 }
  0xa4   :  { %v231_v56 = vmax.f32 %v229_v55, 0.0 }
  0xa6   :  { %v235_v57 = vsel %vm233_vm1, %v231_v56, 0 }
  0xa7   :  { %v257_v58 = vand.u32 4294901760, %v235_v57 }
  0xa9   :  { %v258_v59 = vsub.f32 %v235_v57, %v257_v58  ;;  %303 = vmatmul.f32.vlgmr.msrb.gmra.mxu3 %v257_v58 }
  0xab   :  { %333 = vmatmul.f32.vlgmr.msra.gmra.mxu0 %v258_v59  ;;  %v259_v60 = vand.u32 4294901760, %v258_v59 }
  0xad   :  { %360 = vmatmul.f32.vlgmr.msra.gmra.mxu1 %v259_v60  ;;  %v260_v61 = vsub.f32 %v258_v59, %v259_v60 }
  0xaf   :  { %v261_v62 = vand.u32 4294901760, %v260_v61 }
  0xb1   :  { %262 = vmatmul.f32.vlgmr.msrb.gmra.mxu2 %v261_v62  ;;  %418 = vmatmul.f32.vlgmr.msra.gmra.mxu3 %v257_v58 }
  0xb9   :  { %393 = vmatmul.f32.vlgmr.msra.gmra.mxu2 %v257_v58 }
 0x128   :  { %v334_v4 = vpop.f32.mrf.mxu0 }
 0x12a   :  { %v361_v6 = vpop.f32.mrf.mxu1 }
 0x12c   :  { %v304_v0 = vpop.f32.mrf.mxu3 }
 0x134   :  { %v263_v1 = vpop.f32.mrf.mxu2  ;;  %v419_v10 = vpop.f32.mrf.mxu3 }
 0x135   :  { %v264_v2 = vadd.f32 %v636_v63, %v263_v1 }
 0x137   :  { %v305_v3 = vadd.f32 %v304_v0, %v264_v2 }
 0x139   :  { %v335_v5 = vadd.f32 %v334_v4, %v305_v3 }
 0x13b   :  { %v362_v7 = vadd.f32 %v361_v6, %v335_v5 }
 0x13c   :  { %v394_v8 = vpop.f32.mrf.mxu2 }
 0x13d   :  { %v395_v9 = vadd.f32 %v394_v8, %v362_v7 }
 0x13f   :  { %v420_v11 = vadd.f32 %v419_v10, %v395_v9 }
 0x141   :  { %v422_v12 = vmax.f32 %v420_v11, 0.0 }
 0x143   :  { %v439_v13 = vmul.f32 %v422_v12, %v422_v12 }
 0x145   :  { %v440_v14 = vsel %vm425_vm2, %v439_v13, 0.0 }
 0x146   :  { %441 = vadd.xlane.f32.xlu0 %v440_v14 }
 0x14e   :  { %427 = vadd.xlane.f32.xlu0 %v426_v17 }
 0x1b9   :  { %v442_v18 = vpop.xlane.xlu0 %441 }
 0x1ba   :  { %637 = vrsqrt.f32 %v442_v18  ;;  %vm449_vm4 = vweird.f32 %v442_v18 }
 0x1c0   :  { %v638_v20 = vpop.eup %637 }
 0x1c1   :  { %v444_v22 = vmul.f32 %v638_v20, %v442_v18  ;;  %vm450_vm3 = vweird.f32 %v638_v20  ;;  %v428_v39 = vpop.xlane.xlu0 %427 }
 0x1c2   :  { %vm451_vm5 = vmor %vm449_vm4, %vm450_vm3  ;;  %639 = vrsqrt.f32 %v428_v39  ;;  %vm435_vm6 = vweird.f32 %v428_v39 }
 0x1c3   :  { %v445_v23 = vmul.f32 %v638_v20, %v444_v22 }
 0x1c5   :  { %v446_v25 = vmul.f32 0.5, %v445_v23 }
 0x1c7   :  { %v447_v26 = vsub.f32 1.5, %v446_v25 }
 0x1c8   :  { %v640_v40 = vpop.eup %639 }
 0x1c9   :  { %v448_v28 = vmul.f32 %v638_v20, %v447_v26  ;;  %v430_v41 = vmul.f32 %v640_v40, %v428_v39  ;;  %vm436_vm7 = vweird.f32 %v640_v40 }
 0x1ca   :  { %vm437_vm8 = vmor %vm435_vm6, %vm436_vm7 }
 0x1cb   :  { %v452_v29 = vsel %vm451_vm5, %v638_v20, %v448_v28  ;;  %v431_v42 = vmul.f32 %v640_v40, %v430_v41 }
 0x1cc   :  { %v453_v30 = vmul.f32 %v452_v29, %v422_v12 }
 0x1cd   :  { %v432_v43 = vmul.f32 0.5, %v431_v42 }
 0x1ce   :  { %v458_v32 = vsel %vm425_vm2, %v453_v30, 0 }
 0x1cf   :  { %v475_v33 = vand.u32 4294901760, %v458_v32  ;;  %v433_v45 = vsub.f32 1.5, %v432_v43 }
 0x1d1   :  { %476 = vmatpush.xpose.msrb.mxu0 %v475_v33  ;;  %552 = vmatpush.xpose.msrb.mxu3 %v475_v33  ;;  %v502_v35 = vsub.f32 %v458_v32, %v475_v33  ;;  %v434_v49 = vmul.f32 %v640_v40, %v433_v45 }
 0x1d3   :  { %529 = vmatpush.xpose.msrb.mxu2 %v502_v35  ;;  %v503_v36 = vand.u32 4294901760, %v502_v35  ;;  %v438_v54 = vsel %vm437_vm8, %v640_v40, %v434_v49 }
 0x1d4   :  { %482 = vmatmul.f32.vlgmr.msrb.gmra.mxu0 %v481_v34  ;;  %556 = vmatmul.f32.vlgmr.msrb.gmra.mxu3 %v479_v27  ;;  %v606_v58 = vmul.f32 25.0, %v438_v54 }
 0x1d5   :  { %578 = vmatpush.xpose.msra.mxu0 %v503_v36  ;;  %v504_v37 = vsub.f32 %v502_v35, %v503_v36 }
 0x1d6   :  { %532 = vmatmul.f32.vlgmr.msrb.gmra.mxu2 %v478_v24 }
 0x1d7   :  { %v505_v38 = vand.u32 4294901760, %v504_v37 }
 0x1d9   :  { %506 = vmatpush.xpose.msrb.mxu1 %v505_v38 }
 0x1dc   :  { %508 = vmatmul.f32.vlgmr.msrb.gmra.mxu1 %v477_v21  ;;  %580 = vmatmul.f32.vlgmr.msra.gmra.mxu0 %v477_v21 }
 0x1dd   :  { %600 = vmatpush.xpose.msra.mxu1 %v475_v33 }
 0x1e4   :  { %602 = vmatmul.f32.vlgmr.msra.gmra.mxu1 %v477_v21 }
 0x251   :  { %v483_v44 = vpop.f32.mrf.mxu0 }
 0x257   :  { %v557_v50 = vpop.f32.mrf.mxu3 }
 0x259   :  { %v509_v46 = vpop.f32.mrf.mxu1  ;;  %v533_v47 = vpop.f32.mrf.mxu2 }
 0x25a   :  { %v510_v48 = vadd.f32 %v509_v46, %v483_v44  ;;  %v581_v52 = vpop.f32.mrf.mxu0 }
 0x25c   :  { %v534_v51 = vadd.f32 %v533_v47, %v510_v48 }
 0x25e   :  { %v558_v53 = vadd.f32 %v557_v50, %v534_v51 }
 0x260   :  { %v582_v55 = vadd.f32 %v581_v52, %v558_v53 }
 0x261   :  { %v603_v56 = vpop.f32.mrf.mxu1 }
 0x262   :  { %v604_v57 = vadd.f32 %v603_v56, %v582_v55 }
 0x264   :  { %v607_v59 = vmul.f32 %v606_v58, %v604_v57 }
 0x266   :  { %v609_v60 = vsel %vm608_vm9, %v607_v59, 0.0 }
 0x267   :  { %610 = vst [vmem:[#allocation8] sm:$0xff] %v609_v60 }
 0x268   :  { %621 = dma.vmem_to_hbm [thread:$0]  %s617_s2, 128, %s619_s30, [#allocation4]  }
 0x269   :  { %741 = dma.done.wait [#allocation4], 128  }
 0x26a   :  { %742 = vsyncadd [#allocation4], 4294967168 }
 0x26b   :  { %626 = vsyncpa [#allocation3], 1 }
 0x26c   :  { %627 = vsyncpa [#allocation6], 1 }
 0x26d   :  { %628 = vsyncpa [#allocation4], 1 }

</bundles_post_ra>
